<compile_context>
chip_gen: v7x
topology: tpu7x:2x2x1
jax: 0.10.0
libtpu: 0.0.40
codegen_flags: <defaults>
</compile_context>

<pallas_src>
import functools

import jax
import jax.numpy as jnp
from jax.experimental import pallas as pl
from jax.experimental.pallas import tpu as pltpu


# ---------------------------------------------------------------------------
# Helpers
# ---------------------------------------------------------------------------
def _round_up(v, m):
    return ((v + m - 1) // m) * m


def _cdiv(a, b):
    return (a + b - 1) // b


def _vmem_capacity_bytes():
    """Physical VMEM of the current generation; conservative fallback = v7x."""
    try:
        return int(pltpu.get_tpu_info().vmem_capacity_bytes)
    except Exception:
        return 64 << 20


_ROW_TILE_CAP = 512        # 512-row tiles already hit ~85% of the HBM roofline
_SPLIT_WEIGHT_FRAC = 0.5   # split D_h when 2x-buffered weights exceed this frac of budget


# ---------------------------------------------------------------------------
# Kernel bodies
# ---------------------------------------------------------------------------
def _mlp_kernel(x_ref, w1_ref, b1_ref, w2_ref, b2_ref, o_ref, *, act):
    """Whole hidden dim VMEM-resident: one (TM, D_in) row tile per grid step."""
    h = jnp.dot(x_ref[...], w1_ref[...], preferred_element_type=jnp.float32)
    h = jnp.maximum(h + b1_ref[...], 0.0)                 # b1 is (1, D_h_p)
    y = jnp.dot(h.astype(w2_ref.dtype), w2_ref[...],
                preferred_element_type=jnp.float32)
    y = y + b2_ref[...]                                   # b2 is (1, D_out_p)
    if act == "relu":
        y = jnp.maximum(y, 0.0)
    else:  # matches the PyTorch `else: torch.sigmoid(...)` branch
        y = jax.nn.sigmoid(y)
    o_ref[...] = y.astype(o_ref.dtype)


def _mlp_kernel_hsplit(x_ref, w1_ref, b1_ref, w2_ref, b2_ref, o_ref, acc_ref, *, act):
    """Hidden dim streamed over an 'arbitrary' grid axis; fc2 accumulates in f32."""
    k = pl.program_id(1)

    @pl.when(k == 0)
    def _():
        acc_ref[...] = jnp.zeros_like(acc_ref)

    h = jnp.dot(x_ref[...], w1_ref[...], preferred_element_type=jnp.float32)
    h = jnp.maximum(h + b1_ref[...], 0.0)                 # b1 chunk is (1, TH)
    acc_ref[...] += jnp.dot(h.astype(w2_ref.dtype), w2_ref[...],
                            preferred_element_type=jnp.float32)

    @pl.when(k == pl.num_programs(1) - 1)
    def _():
        y = acc_ref[...] + b2_ref[...]
        if act == "relu":
            y = jnp.maximum(y, 0.0)
        else:
            y = jax.nn.sigmoid(y)
        o_ref[...] = y.astype(o_ref.dtype)


# ---------------------------------------------------------------------------
# Wrapper: (B, *, D_in) -> (B, *, D_out)
# ---------------------------------------------------------------------------
def mlp_forward(x, w1, b1, w2, b2, act="relu", *,
                compute_dtype=None, force_hidden_split=False, hidden_tile=None):
    """Fused MLP matching PyTorch MLP.forward.

    w1: (D_in, D_h), w2: (D_h, D_out) — i.e. transposed nn.Linear weights.
    compute_dtype: optional (e.g. jnp.bfloat16) accuracy-gated MXU-native path.
    """
    dim_in, dim_h = w1.shape
    dim_out = w2.shape[1]
    lead = x.shape[:-1]
    out_dtype = x.dtype

    x2d = x.reshape(-1, dim_in)                            # == x.view(-1, dim_in)
    n = x2d.shape[0]

    if compute_dtype is not None:
        x2d = x2d.astype(compute_dtype)
        w1 = w1.astype(compute_dtype)
        w2 = w2.astype(compute_dtype)

    # Lane-dense padding of the small weight matrices only (zeros are inert:
    # padded hidden cols -> zero weight + zero bias -> relu -> 0 -> zero w2 rows;
    # padded output cols are sliced off).  x itself is NOT copied/padded.
    d_h_p = _round_up(dim_h, 128)
    d_out_p = _round_up(dim_out, 128)

    d_in_eff = dim_in
    if dim_in % 8 != 0:
        # Rare corner case: keep x's lane dim sublane-aligned for the MXU feed.
        d_in_eff = _round_up(dim_in, 8)
        x2d = jnp.pad(x2d, ((0, 0), (0, d_in_eff - dim_in)))

    w1_p = jnp.pad(w1, ((0, d_in_eff - dim_in), (0, d_h_p - dim_h)))
    w2_p = jnp.pad(w2, ((0, d_h_p - dim_h), (0, d_out_p - dim_out)))
    b1_p = jnp.pad(b1.reshape(1, -1).astype(jnp.float32),
                   ((0, 0), (0, d_h_p - dim_h)))
    b2_p = jnp.pad(b2.reshape(1, -1).astype(jnp.float32),
                   ((0, 0), (0, d_out_p - dim_out)))

    x_isz = jnp.dtype(x2d.dtype).itemsize
    o_isz = jnp.dtype(out_dtype).itemsize
    w_isz = jnp.dtype(w1_p.dtype).itemsize                 # weight dtype, not x dtype
    cast_isz = w_isz if w1_p.dtype != jnp.float32 else 0   # bf16 cast copy of h
    row_align = 8 * max(1, 4 // x_isz)                     # f32 -> 8 rows, bf16 -> 16

    # Generation-aware VMEM budget (v5e/v6e: 128 MiB physical, v7x: 64 MiB).
    capacity = _vmem_capacity_bytes()
    budget = int(0.78 * capacity)
    vmem_limit = int(0.85 * capacity)

    # Default pipeline double-buffers every input, even constant-index ones.
    w_bytes_db = 2 * ((d_in_eff * d_h_p + d_h_p * d_out_p) * w_isz
                      + (d_h_p + d_out_p) * 4)

    def foot_simple(tm):
        return (w_bytes_db
                + 2 * tm * (d_in_eff * x_isz + d_out_p * o_isz)   # x/out, 2x buffered
                + tm * d_h_p * (4 + cast_isz)                     # f32 h (+ cast copy)
                + tm * d_out_p * 4)                               # y temp

    def shrink_to_budget(tm, foot_fn):
        while tm > row_align and foot_fn(tm) > budget:
            tm = max(row_align, _round_up(tm // 2, row_align))
        return tm

    def ensure_two_steps(tm):
        # v7x has two TensorCores; >=2 "parallel" grid steps also enables any
        # DMA/compute overlap at all.
        while _cdiv(n, tm) < 2 and tm > row_align:
            tm = max(row_align, _round_up(tm // 2, row_align))
        return tm

    cost = pl.CostEstimate(
        flops=2 * n * (d_in_eff * d_h_p + d_h_p * d_out_p),
        transcendentals=0 if act == "relu" else n * d_out_p,
        bytes_accessed=(n * d_in_eff * x_isz
                        + (d_in_eff * d_h_p + d_h_p * d_out_p) * w_isz
                        + n * d_out_p * o_isz),
    )

    use_split = (force_hidden_split
                 or w_bytes_db > _SPLIT_WEIGHT_FRAC * budget
                 or foot_simple(row_align) > budget)

    if not use_split:
        # ------------------ resident-weight path ------------------
        tm = min(_ROW_TILE_CAP, _round_up(max(n, 1), row_align))
        tm = shrink_to_budget(tm, foot_simple)
        tm = ensure_two_steps(tm)
        grid = (_cdiv(n, tm),)

        out2d = pl.pallas_call(
            functools.partial(_mlp_kernel, act=act),
            out_shape=jax.ShapeDtypeStruct((n, d_out_p), out_dtype),
            grid=grid,
            in_specs=[
                pl.BlockSpec((tm, d_in_eff), lambda i: (i, 0)),      # x: streamed rows
                pl.BlockSpec((d_in_eff, d_h_p), lambda i: (0, 0)),   # w1: VMEM-resident
                pl.BlockSpec((1, d_h_p), lambda i: (0, 0)),          # b1
                pl.BlockSpec((d_h_p, d_out_p), lambda i: (0, 0)),    # w2: VMEM-resident
                pl.BlockSpec((1, d_out_p), lambda i: (0, 0)),        # b2
            ],
            out_specs=pl.BlockSpec((tm, d_out_p), lambda i: (i, 0)),
            compiler_params=pltpu.CompilerParams(
                dimension_semantics=("parallel",),
                vmem_limit_bytes=vmem_limit,
            ),
            cost_estimate=cost,
        )(x2d, w1_p, b1_p, w2_p, b2_p)
    else:
        # ------------------ D_h-split (reduction) path ------------------
        def foot_split(tm, th):
            return (2 * ((d_in_eff * th + th * d_out_p) * w_isz + th * 4)  # w1/w2/b1 tiles
                    + 2 * d_out_p * 4                                      # b2
                    + 2 * tm * (d_in_eff * x_isz + d_out_p * o_isz)        # x/out tiles
                    + tm * th * (4 + cast_isz)                             # h (+ cast)
                    + 2 * tm * d_out_p * 4)                                # acc scratch + temp

        # Hidden tile must divide d_h_p exactly so no garbage from a partial
        # reduction block can reach valid output rows.
        if hidden_tile is not None and hidden_tile % 128 == 0 and d_h_p % hidden_tile == 0:
            th = int(hidden_tile)
        else:
            th = 128
            for cand in (512, 384, 256):
                if cand <= d_h_p and d_h_p % cand == 0 and foot_split(row_align, cand) <= budget:
                    th = cand
                    break

        tm = min(_ROW_TILE_CAP, _round_up(max(n, 1), row_align))
        tm = shrink_to_budget(tm, lambda t: foot_split(t, th))
        tm = ensure_two_steps(tm)
        grid = (_cdiv(n, tm), d_h_p // th)

        out2d = pl.pallas_call(
            functools.partial(_mlp_kernel_hsplit, act=act),
            out_shape=jax.ShapeDtypeStruct((n, d_out_p), out_dtype),
            grid=grid,
            in_specs=[
                pl.BlockSpec((tm, d_in_eff), lambda i, k: (i, 0)),   # x: constant over k
                pl.BlockSpec((d_in_eff, th), lambda i, k: (0, k)),   # w1 column tiles
                pl.BlockSpec((1, th), lambda i, k: (0, k)),          # b1 chunks
                pl.BlockSpec((th, d_out_p), lambda i, k: (k, 0)),    # w2 row tiles
                pl.BlockSpec((1, d_out_p), lambda i, k: (0, 0)),     # b2
            ],
            out_specs=pl.BlockSpec((tm, d_out_p), lambda i, k: (i, 0)),
            scratch_shapes=[pltpu.VMEM((tm, d_out_p), jnp.float32)],
            compiler_params=pltpu.CompilerParams(
                dimension_semantics=("parallel", "arbitrary"),
                vmem_limit_bytes=vmem_limit,
            ),
            cost_estimate=cost,
        )(x2d, w1_p, b1_p, w2_p, b2_p)

    return out2d[:, :dim_out].astype(out_dtype).reshape(*lead, dim_out)


# ---------------------------------------------------------------------------
# Deterministic synthetic init (roughly nn.Linear scale) + pure-JAX reference.
# ---------------------------------------------------------------------------
def init_mlp_params(key, dim_in, dim_h, dim_out, dtype=jnp.float32):
    k1, k2, k3, k4 = jax.random.split(key, 4)
    lim1 = 1.0 / jnp.sqrt(dim_in)
    lim2 = 1.0 / jnp.sqrt(dim_h)
    w1 = jax.random.uniform(k1, (dim_in, dim_h), dtype, -lim1, lim1)
    b1 = jax.random.uniform(k2, (dim_h,), dtype, -lim1, lim1)
    w2 = jax.random.uniform(k3, (dim_h, dim_out), dtype, -lim2, lim2)
    b2 = jax.random.uniform(k4, (dim_out,), dtype, -lim2, lim2)
    return w1, b1, w2, b2


def mlp_reference(x, w1, b1, w2, b2, act="relu"):
    lead = x.shape[:-1]
    x2d = x.reshape(-1, w1.shape[0])
    h = jnp.maximum(x2d @ w1 + b1, 0.0)
    y = h @ w2 + b2
    y = jnp.maximum(y, 0.0) if act == "relu" else jax.nn.sigmoid(y)
    return y.reshape(*lead, w2.shape[1])


if __name__ == "__main__":
    B, S, dim_in, dim_h, dim_out = 2, 8, 16, 32, 16
    key = jax.random.PRNGKey(0)
    kx, kp = jax.random.split(key)
    x = jax.random.normal(kx, (B, S, dim_in), jnp.float32)
    w1, b1, w2, b2 = init_mlp_params(kp, dim_in, dim_h, dim_out)

    ok = True

    # 1) Resident-weight fast path, both activation branches.
    for act in ("relu", "sigmoid"):
        out = jax.block_until_ready(mlp_forward(x, w1, b1, w2, b2, act=act))
        ref = mlp_reference(x, w1, b1, w2, b2, act=act)
        ok &= out.shape == (B, S, dim_out)
        ok &= bool(jnp.allclose(out, ref, atol=1e-4, rtol=1e-4))

    # 2) D_h-split (reduction) path, forced at small shapes for coverage.
    dim_in2, dim_h2, dim_out2 = 32, 320, 48
    kx2, kp2 = jax.random.split(jax.random.PRNGKey(0))
    x2 = jax.random.normal(kx2, (B, S, dim_in2), jnp.float32)
    p2 = init_mlp_params(kp2, dim_in2, dim_h2, dim_out2)
    for act in ("relu", "sigmoid"):
        out = jax.block_until_ready(
            mlp_forward(x2, *p2, act=act, force_hidden_split=True, hidden_tile=128))
        ref = mlp_reference(x2, *p2, act=act)
        ok &= out.shape == (B, S, dim_out2)
        ok &= bool(jnp.allclose(out, ref, atol=1e-4, rtol=1e-4))

    # 3) Optional accuracy-gated bf16 compute path (MXU-native).
    out = jax.block_until_ready(
        mlp_forward(x, w1, b1, w2, b2, act="relu", compute_dtype=jnp.bfloat16))
    ref = mlp_reference(x, w1, b1, w2, b2, act="relu")
    ok &= bool(jnp.allclose(out, ref, atol=5e-2, rtol=5e-2))

    if ok:
        print("KERNEL_OK")
</pallas_src>

<mosaic_0001>
module attributes {stable_mosaic.version = 11 : i64} {
  func.func @_mlp_kernel(%arg0: i32, %arg1: memref<8x16xf32, #tpu.memory_space<vmem>>, %arg2: memref<16x128xf32, #tpu.memory_space<vmem>>, %arg3: memref<1x128xf32, #tpu.memory_space<vmem>>, %arg4: memref<128x128xf32, #tpu.memory_space<vmem>>, %arg5: memref<1x128xf32, #tpu.memory_space<vmem>>, %arg6: memref<8x128xf32, #tpu.memory_space<vmem>>) attributes {dimension_semantics = [#tpu.dimension_semantics<parallel>], iteration_bounds = array<i64: 2>, scalar_prefetch = 0 : i64, scratch_operands = 0 : i64, tpu.core_type = #tpu.core_type<tc>, window_params = [{transform_indices = @transform_0, window_bounds = array<i64: 8, 16>}, {pipeline_mode = #tpu.pipeline_mode<synchronous>, transform_indices = @transform_1, window_bounds = array<i64: 16, 128>}, {pipeline_mode = #tpu.pipeline_mode<synchronous>, transform_indices = @transform_2, window_bounds = array<i64: 1, 128>}, {pipeline_mode = #tpu.pipeline_mode<synchronous>, transform_indices = @transform_3, window_bounds = array<i64: 128, 128>}, {pipeline_mode = #tpu.pipeline_mode<synchronous>, transform_indices = @transform_4, window_bounds = array<i64: 1, 128>}, {transform_indices = @transform_5, window_bounds = array<i64: 8, 128>}]} {
    %c0 = arith.constant 0 : index
    %c0_0 = arith.constant 0 : index
    %0 = vector.load %arg1[%c0, %c0_0] : memref<8x16xf32, #tpu.memory_space<vmem>>, vector<8x16xf32>
    %c0_1 = arith.constant 0 : index
    %c0_2 = arith.constant 0 : index
    %1 = vector.load %arg2[%c0_1, %c0_2] : memref<16x128xf32, #tpu.memory_space<vmem>>, vector<16x128xf32>
    %cst = arith.constant dense<0.000000e+00> : vector<8x128xf32>
    %2 = tpu.matmul %0, %1, %cst {dimension_numbers = #tpu.dot_dimension_numbers<[1], [0], [0], [1], [0, 0, 1, 1], [], []>} : vector<8x16xf32>, vector<16x128xf32>, vector<8x128xf32> -> vector<8x128xf32>
    %c0_3 = arith.constant 0 : index
    %c0_4 = arith.constant 0 : index
    %3 = vector.load %arg3[%c0_3, %c0_4] : memref<1x128xf32, #tpu.memory_space<vmem>>, vector<1x128xf32>
    %4 = vector.broadcast %3 : vector<1x128xf32> to vector<8x128xf32>
    %5 = arith.addf %2, %4 : vector<8x128xf32>
    %cst_5 = arith.constant 0.000000e+00 : f32
    %6 = vector.broadcast %cst_5 : f32 to vector<8x128xf32>
    %7 = arith.maximumf %5, %6 : vector<8x128xf32>
    %c0_6 = arith.constant 0 : index
    %c0_7 = arith.constant 0 : index
    %8 = vector.load %arg4[%c0_6, %c0_7] : memref<128x128xf32, #tpu.memory_space<vmem>>, vector<128x128xf32>
    %cst_8 = arith.constant dense<0.000000e+00> : vector<8x128xf32>
    %9 = tpu.matmul %7, %8, %cst_8 {dimension_numbers = #tpu.dot_dimension_numbers<[1], [0], [0], [1], [0, 0, 1, 1], [], []>} : vector<8x128xf32>, vector<128x128xf32>, vector<8x128xf32> -> vector<8x128xf32>
    %c0_9 = arith.constant 0 : index
    %c0_10 = arith.constant 0 : index
    %10 = vector.load %arg5[%c0_9, %c0_10] : memref<1x128xf32, #tpu.memory_space<vmem>>, vector<1x128xf32>
    %11 = vector.broadcast %10 : vector<1x128xf32> to vector<8x128xf32>
    %12 = arith.addf %9, %11 : vector<8x128xf32>
    %cst_11 = arith.constant 0.000000e+00 : f32
    %13 = vector.broadcast %cst_11 : f32 to vector<8x128xf32>
    %14 = arith.maximumf %12, %13 : vector<8x128xf32>
    %c0_12 = arith.constant 0 : index
    %c0_13 = arith.constant 0 : index
    %15 = vector.load %arg6[%c0_12, %c0_13] : memref<8x128xf32, #tpu.memory_space<vmem>>, vector<8x128xf32>
    tpu.vector_store %arg6[%c0_12, %c0_13], %14 {strides = array<i32>} : memref<8x128xf32, #tpu.memory_space<vmem>>, vector<8x128xf32>,
    return
  }
  func.func @transform_0(%arg0: i32) -> (i32, i32) {
    %c0_i32 = arith.constant 0 : i32
    %c0_i32_0 = arith.constant 0 : i32
    return %arg0, %c0_i32 : i32, i32
  }
  func.func @transform_1(%arg0: i32) -> (i32, i32) {
    %c0_i32 = arith.constant 0 : i32
    %c0_i32_0 = arith.constant 0 : i32
    %c0_i32_1 = arith.constant 0 : i32
    return %c0_i32, %c0_i32_0 : i32, i32
  }
  func.func @transform_2(%arg0: i32) -> (i32, i32) {
    %c0_i32 = arith.constant 0 : i32
    %c0_i32_0 = arith.constant 0 : i32
    %c0_i32_1 = arith.constant 0 : i32
    return %c0_i32, %c0_i32_0 : i32, i32
  }
  func.func @transform_3(%arg0: i32) -> (i32, i32) {
    %c0_i32 = arith.constant 0 : i32
    %c0_i32_0 = arith.constant 0 : i32
    %c0_i32_1 = arith.constant 0 : i32
    return %c0_i32, %c0_i32_0 : i32, i32
  }
  func.func @transform_4(%arg0: i32) -> (i32, i32) {
    %c0_i32 = arith.constant 0 : i32
    %c0_i32_0 = arith.constant 0 : i32
    %c0_i32_1 = arith.constant 0 : i32
    return %c0_i32, %c0_i32_0 : i32, i32
  }
  func.func @transform_5(%arg0: i32) -> (i32, i32) {
    %c0_i32 = arith.constant 0 : i32
    %c0_i32_0 = arith.constant 0 : i32
    return %arg0, %c0_i32 : i32, i32
  }
}

</mosaic_0001>

<bundles_post_ra>
// kernel: tpu_custom_call.1
= control target key start
LH: loop header
LB: loop body
LE: loop exit
PB: predicated region body
PF: predicated region fallthrough
CT: control target
= control target key end

     0   :  { %10 = vsyncpa [#allocation3], 0  ;;  %s1168_s0 = inlined_call_operand.hbm [shape: f32[16,16], index: 0, kind: input, shape index: {}]   ;;  %s1169_s1 = inlined_call_operand.hbm [shape: f32[16,128], index: 1, kind: input, shape index: {}]   ;;  %s1170_s2 = inlined_call_operand.vmem [shape: f32[1,128], index: 2, kind: input, shape index: {}]   ;;  %s1171_s3 = inlined_call_operand.hbm [shape: f32[128,128], index: 3, kind: input, shape index: {}]   ;;  %s1172_s4 = inlined_call_operand.vmem [shape: f32[1,128], index: 4, kind: input, shape index: {}]   ;;  %s1173_s5 = inlined_call_operand.hbm [shape: f32[16,128], index: 5, kind: output, shape index: {}]  }
   0x1   :  { %12 = vsyncpa [#allocation3 + $0x1], 0 }
   0x2   :  { %13 = vsyncpa [#allocation6], 0 }
   0x3   :  { %14 = vsyncpa [#allocation4], 0 }
   0x4   :  { %16 = vsyncpa [#allocation4 + $0x1], 0  ;;  %s929_s18 = smov 0   ;;  %s931_s19 = smov 0  }
   0x5   :  { %s933_s20 = smov 0   ;;  %s935_s21 = smov 0  }
   0x6 LB: > { %s950_s22 = sadd.s32 4294967295, %s888_s21   ;;  %s552_s23 = sadd.s32 4294967294, %s888_s21   ;;  %s888_s21 = sphi %s935_s21, %s1193_s21   ;;  %s884_s20 = sphi %s933_s20, %s1192_s20   ;;  %s880_s19 = sphi %s931_s19, %s1191_s19   ;;  %s876_s18 = sphi %s929_s18, %s1190_s18  }
   0x7   : > { %p42_p0 = scmp.ne.s32.totalorder %s880_s19, %s876_s18  ;;  %p1174_p1 = scmp.eq.s32.totalorder %s950_s22, 0 }
   0x8   : > { %p156_p3 = scmp.eq.s32.totalorder %s552_s23, 1  ;;  %p553_p5 = scmp.ge.s32.totalorder %s888_s21, 1 }
   0x9   : > { %p959_p4 = por %p1174_p1, %p42_p0  ;;  %p163_p7 = scmp.lt.s32.totalorder %s888_s21, 3 }
   0xa   : > { %p964_p6 = por %p156_p3, %p42_p0  ;;  %s890_s27 = smov [#allocation5]  }
   0xb   : > { %s1177_s24 = scalar_select %p959_p4, 1, 0 }
   0xc   : > { %s1178_s25 = scalar_select %p964_p6, 1, 0 }
   0xd   : > { %p969_p8 = pnand %p553_p5, %p163_p7  ;;  %s175_s28 = sshll.u32 %s890_s27, 4  ;;  %s973_s28 = int_to_ptr.vmem [resolvable:$true] %s175_s28 }
   0xe   : > { %s891_s30 = smov [#allocation7]   ;;  %s732_s9 = scalar_lea.hbm %s1169_s1, 256 }
   0xf   : > { %p672_p9 = pneg %p969_p8  ;;  %s191_s6 = sshll.u32 %s891_s30, 4  ;;  %s984_s6 = int_to_ptr.vmem [resolvable:$true] %s191_s6 }
  0x10   : > { %p733_p12 = scmp.ne.s32.totalorder %s1169_s1, %s732_s9  ;;  %p739_p5 = scmp.lt.u32.totalorder %s732_s9, %s1169_s1 }
  0x11   : > { %p980_p11 = pnand %p672_p9, %p1174_p1 }
  0x13   : > { %p734_p13 = pneg %p980_p11 }
  0x15   : > { %p735_p0 = pnand %p734_p13, %p733_p12 }
  0x17   : > { %p736_p3 = pneg %p735_p0 }
  0x19   : > { %p741_p7 = pnand %p739_p5, %p736_p3 }
  0x1b   : > { %744 = shalt.err (!%p741_p7)
}
  0x1c   : > { %s745_s14 = scalar_lea.vmem %s973_s28, 256  ;;  %p753_p2 = scmp.lt.s32.totalorder %s973_s28, %s973_s28 }
  0x1d   : > { %p746_p9 = scmp.ne.s32.totalorder %s973_s28, %s745_s14  ;;  %p754_p12 = scmp.lt.s32.totalorder %s745_s14, %s745_s14 }
  0x1f   : > { %p748_p10 = pnand %p746_p9, %p734_p13  ;;  %p755_p0 = por %p754_p12, %p753_p2 }
  0x21   : > { %p749_p1 = pneg %p748_p10 }
  0x23   : > { %p756_p6 = pnand %p755_p0, %p749_p1 }
  0x25   : > { %759 = shalt.err (!%p756_p6)
}
  0x26   : > { %s892_s15 = smov 128   ;;  %s893_s16 = smov 8  }
  0x27   : > { %675 = dma.hbm_to_vmem [thread:$0]  (!%p980_p11), %s1169_s1, 256, %s973_s28, [#allocation6], %s892_s15, %s892_s15, %s893_s16  }
  0x28   : > { %s760_s7 = scalar_lea.hbm %s1171_s3, 2048 }
  0x29   : > { %p761_p2 = scmp.ne.s32.totalorder %s1171_s3, %s760_s7  ;;  %p767_p10 = scmp.lt.u32.totalorder %s760_s7, %s1171_s3 }
  0x2b   : > { %p763_p1 = pnand %p761_p2, %p734_p13 }
  0x2d   : > { %p764_p6 = pneg %p763_p1 }
  0x2f   : > { %p769_p3 = pnand %p767_p10, %p764_p6 }
  0x31   : > { %772 = shalt.err (!%p769_p3)
}
  0x32   : > { %s773_s28 = scalar_lea.vmem %s984_s6, 2048  ;;  %p781_p12 = scmp.lt.s32.totalorder %s984_s6, %s984_s6 }
  0x33   : > { %p774_p5 = scmp.ne.s32.totalorder %s984_s6, %s773_s28  ;;  %p782_p0 = scmp.lt.s32.totalorder %s773_s28, %s773_s28 }
  0x35   : > { %p776_p7 = pnand %p774_p5, %p734_p13  ;;  %p783_p2 = por %p782_p0, %p781_p12 }
  0x37   : > { %p777_p9 = pneg %p776_p7 }
  0x39   : > { %p784_p1 = pnand %p783_p2, %p777_p9 }
  0x3b   : > { %787 = shalt.err (!%p784_p1)
}
  0x3c   : > { %678 = dma.hbm_to_vmem [thread:$0]  (!%p980_p11), %s1171_s3, 2048, %s984_s6, [#allocation6], %s892_s15, %s892_s15, %s893_s16  }
  0x3d   : > { %s1039_s14 = sadd.s32 1, %s888_s21   ;;  %s29_s29 = sadd.s32 1, %s884_s20 }
  0x3e   : > { %s26_s17 = ssub.s32 %s888_s21, %s1039_s14  ;;  %p36_p13 = scmp.ne.s32.totalorder %s884_s20, %s880_s19 }
  0x3f   : > { %p27_p6 = scmp.eq.s32.totalorder %s26_s17, 0  ;;  %p37_p10 = scmp.eq.s32.totalorder %s888_s21, 0 }
  0x40   : > { %p1181_p3 = scmp.eq.s32.totalorder %s950_s22, 1  ;;  %p689_p7 = scmp.lt.s32.totalorder %s888_s21, 2 }
  0x41   : > { %s1055_s27 = scalar_select %p27_p6, %s884_s20, %s29_s29  }
  0x42   : > { %p1049_p5 = por %p1181_p3, %p36_p13  ;;  %p38_p9 = por %p37_p10, %p36_p13 }
  0x43   : > { %s208_s30 = sand.u32 1, %s884_s20   ;;  %s558_s6 = sshll.u32 %s888_s21, 7 }
  0x44   : > { %s1182_s23 = scalar_select %p1049_p5, 1, 0 }
  0x45   : > { %s557_s7 = sshll.u32 %s208_s30, 3  ;;  %s1062_s8 = scalar_lea.hbm %s1168_s0, %s558_s6 }
  0x46   : > { %s212_s9 = scalar_lea.vmem [#allocation2], %s557_s7  ;;  %p1066_p11 = pnand %p689_p7, %p38_p9 }
  0x47   : > { %s219_s10 = sshll.u32 %s212_s9, 4  ;;  %s209_s28 = scalar_lea.sflag [#allocation3], %s208_s30  ;;  %s1064_s10 = int_to_ptr.vmem [resolvable:$true] %s219_s10 }
  0x48   : > { %s788_s12 = scalar_lea.hbm %s1062_s8, 128  ;;  %p790_p0 = pneg %p1066_p11 }
  0x49   : > { %p789_p12 = scmp.ne.s32.totalorder %s1062_s8, %s788_s12  ;;  %s793_s17 = scalar_lea.hbm %s1168_s0, 256 }
  0x4a   : > { %p794_p13 = scmp.lt.u32.totalorder %s1062_s8, %s1168_s0  ;;  %p795_p6 = scmp.lt.u32.totalorder %s793_s17, %s788_s12 }
  0x4b   : > { %p791_p2 = pnand %p790_p0, %p789_p12  ;;  %p797_p3 = scmp.lt.u32.totalorder %s788_s12, %s1062_s8 }
  0x4c   : > { %p796_p10 = por %p795_p6, %p794_p13 }
  0x4d   : > { %p792_p1 = pneg %p791_p2 }
  0x4e   : > { %p798_p7 = por %p797_p3, %p796_p10 }
  0x50   : > { %p799_p9 = pnand %p798_p7, %p792_p1 }
  0x52   : > { %802 = shalt.err (!%p799_p9)
}
  0x53   : > { %s803_s30 = scalar_lea.vmem %s1064_s10, 128  ;;  %s894_s15 = smov [#allocation2]  }
  0x54   : > { %p804_p12 = scmp.ne.s32.totalorder %s1064_s10, %s803_s30  ;;  %s808_s16 = sshll.u32 %s894_s15, 4  ;;  %s809_s16 = int_to_ptr.vmem [resolvable:$false] %s808_s16 }
  0x55   : > { %s810_s9 = scalar_lea.vmem %s809_s16, 256  ;;  %p811_p4 = scmp.lt.s32.totalorder %s1064_s10, %s809_s16 }
  0x56   : > { %p806_p2 = pnand %p804_p12, %p790_p0  ;;  %p812_p13 = scmp.lt.s32.totalorder %s810_s9, %s803_s30 }
  0x58   : > { %p807_p5 = pneg %p806_p2  ;;  %p813_p6 = por %p812_p13, %p811_p4 }
  0x5a   : > { %p814_p10 = pnand %p813_p6, %p807_p5 }
  0x5c   : > { %817 = shalt.err (!%p814_p10)
}
  0x5d   : > { %682 = dma.hbm_to_vmem [thread:$0]  (!%p1066_p11), %s1062_s8, 128, %s1064_s10, %s209_s28  }
  0x5e   : > { %228 = sbr.rel (%p969_p8) target bundleno = 557 (0x22d), region = 40  ;;  %s1098_s12 = sand.u32 (!%p969_p8), 1, %s880_s19  }
  0x5f   : > { %s560_s13 = sshll.u32 (!%p969_p8), %s1098_s12, 3  ;;  %s231_s29 = scalar_lea.sflag (!%p969_p8), [#allocation3], %s1098_s12 }
  0x60   : > { %s234_s17 = scalar_lea.vmem (!%p969_p8), [#allocation2], %s560_s13  ;;  %p1184_p4 = scmp.ne.s32.totalorder (!%p969_p8), %s1177_s24, 0 }
  0x65   : > { %863 = dma.done.wait (%p1184_p4), %s231_s29, 128  }
  0x66   : > { %865 = vsyncadd (%p1184_p4), %s231_s29, 4294967168  ;;  %p1185_p5 = scmp.eq.s32.totalorder %s950_s22, 0 }
  0x68   : > { %867 = dma.done.wait (%p1185_p5), [#allocation6], 2304   ;;  %p1186_p8 = pmov %p1185_p5 }
  0x69   : > { %v895_v0 = vmov 0.0|0.0   ;;  %vm896_vm0 = vmmov 0   ;;  %v897_v1 = vmov 0.0   ;;  %v270_v2 = vld [vmem:[#allocation5] sm:$0xff]  ;;  %v271_v3 = vld [vmem:[#allocation5 + $0x8] sm:$0xff]  ;;  %v354_v5 = vld [vmem:[#allocation7] sm:$0xff] }
  0x6a   : > { %869 = vsyncadd (%p1186_p8), [#allocation6], 4294964992  ;;  %633 = vmatprep.subr.bf16.mxu0 %v895_v0  ;;  %595 = vmatprep.mubr.msk.f32.mxu0 %vm896_vm0, %v897_v1  ;;  %v634_v4 = vpack.c.bf16 %v271_v3, %v270_v2  ;;  %v355_v6 = vld [vmem:[#allocation7 + $0x8] sm:$0xff]  ;;  %v356_v7 = vld [vmem:[#allocation7 + $0x10] sm:$0xff]  ;;  %vm279_vm1 = vcmask 130048   ;;  %s568_s11 = sshll.u32 %s950_s22, 7 }
  0x6b   : > { %636 = vmatprep.subr.bf16.mxu1 %v895_v0  ;;  %630 = vmatprep.mubr.msk.f32.mxu1 %vm896_vm0, %v897_v1  ;;  %v637_v8 = vpack.c.bf16 %v355_v6, %v354_v5  ;;  %v357_v9 = vld [vmem:[#allocation7 + $0x18] sm:$0xff]  ;;  %v269_v10 = vld [vmem:[%s234_s17] sm:$0xff]  ;;  %v360_v15 = vld [vmem:[#allocation7 + $0x30] sm:$0xff]  ;;  %s268_s28 = scalar_lea.vmem [#allocation8], %s560_s13  ;;  %s1124_s15 = scalar_lea.hbm %s1173_s5, %s568_s11 }
  0x6c   : > { %635 = vmatpush3.bf16.msra.mxu0 %v634_v4  ;;  %v640_v11 = vpack.c.bf16 %v357_v9, %v356_v7  ;;  %v358_v12 = vld [vmem:[#allocation7 + $0x20] sm:$0xff]  ;;  %v359_v13 = vld [vmem:[#allocation7 + $0x28] sm:$0xff]  ;;  %v361_v16 = vld [vmem:[#allocation7 + $0x38] sm:$0xff]  ;;  %s463_s7 = sshll.u32 %s268_s28, 4  ;;  %s450_s16 = scalar_lea.sflag [#allocation4], %s1098_s12  ;;  %s1126_s7 = int_to_ptr.vmem [resolvable:$true] %s463_s7 }
  0x6d   : > { %638 = vmatpush3.bf16.msra.mxu1 %v637_v8  ;;  %v643_v14 = vpack.c.bf16 %v359_v13, %v358_v12  ;;  %v646_v17 = vpack.c.bf16 %v361_v16, %v360_v15  ;;  %v362_v18 = vld [vmem:[#allocation7 + $0x40] sm:$0xff]  ;;  %v363_v19 = vld [vmem:[#allocation7 + $0x48] sm:$0xff]  ;;  %v364_v21 = vld [vmem:[#allocation7 + $0x50] sm:$0xff]  ;;  %s818_s9 = scalar_lea.vmem %s1126_s7, 128  ;;  %p1187_p0 = scmp.ne.s32.totalorder %s1182_s23, 0 }
  0x6e   : > { %639 = vmatprep.subr.bf16.mxu1 %v895_v0  ;;  %v649_v20 = vpack.c.bf16 %v363_v19, %v362_v18  ;;  %v365_v22 = vld [vmem:[#allocation7 + $0x58] sm:$0xff]  ;;  %v366_v24 = vld [vmem:[#allocation7 + $0x60] sm:$0xff]  ;;  %v367_v25 = vld [vmem:[#allocation7 + $0x68] sm:$0xff]  ;;  %p819_p11 = scmp.ne.s32.totalorder %s1126_s7, %s818_s9  ;;  %s898_s22 = smov [#allocation8]  }
  0x6f   : > { %596 = vmatmul.mubr.msk.f32.vlgmr.msra.gmra.mrb[0].mxu0 %vm279_vm1, %v269_v10  ;;  %v652_v23 = vpack.c.bf16 %v365_v22, %v364_v21  ;;  %v655_v26 = vpack.c.bf16 %v367_v25, %v366_v24  ;;  %v368_v27 = vld [vmem:[#allocation7 + $0x70] sm:$0xff]  ;;  %v369_v28 = vld [vmem:[#allocation7 + $0x78] sm:$0xff]  ;;  %v564_v30 = vld [vmem:[%s1170_s2] ss:$0 sm:$0xff]  ;;  %s822_s13 = sshll.u32 %s898_s22, 4  ;;  %s823_s13 = int_to_ptr.vmem [resolvable:$false] %s822_s13 }
  0x70   : > { %v658_v29 = vpack.c.bf16 %v369_v28, %v368_v27  ;;  %v566_v35 = vld [vmem:[%s1172_s4] ss:$0 sm:$0xff]  ;;  %p820_p1 = pnand %p819_p11, %p1187_p0  ;;  %s824_s29 = scalar_lea.vmem %s823_s13, 256 }
  0x71   : > { %641 = vmatpush3.bf16.msra.mxu1 %v640_v11  ;;  %p825_p7 = scmp.lt.s32.totalorder %s1126_s7, %s823_s13  ;;  %p826_p9 = scmp.lt.s32.totalorder %s824_s29, %s818_s9 }
  0x72   : > { %642 = vmatprep.subr.bf16.mxu1 %v895_v0  ;;  %p821_p3 = pneg %p820_p1 }
  0x73   : > { %p827_p12 = por %p826_p9, %p825_p7 }
  0x75   : > { %644 = vmatpush3.bf16.msra.mxu1 %v643_v14  ;;  %p828_p2 = pnand %p827_p12, %p821_p3 }
  0x76   : > { %645 = vmatprep.subr.bf16.mxu1 %v895_v0 }
  0x79   : > { %647 = vmatpush3.bf16.msra.mxu1 %v646_v17 }
  0x7a   : > { %648 = vmatprep.subr.bf16.mxu1 %v895_v0 }
  0x7d   : > { %650 = vmatpush3.bf16.msra.mxu1 %v649_v20 }
  0x7e   : > { %651 = vmatprep.subr.bf16.mxu1 %v895_v0 }
  0x81   : > { %653 = vmatpush3.bf16.msra.mxu1 %v652_v23 }
  0x82   : > { %654 = vmatprep.subr.bf16.mxu1 %v895_v0 }
  0x85   : > { %656 = vmatpush3.bf16.msra.mxu1 %v655_v26 }
  0x86   : > { %657 = vmatprep.subr.bf16.mxu1 %v895_v0 }
  0x89   : > { %659 = vmatpush3.bf16.msra.mxu1 %v658_v29 }
 0x142   : > { %v349_v31 = vpop.f32.mrb[0].mxu0 }
 0x143   : > { %v350_v32 = vadd.f32 %v564_v30, %v349_v31  ;;  %v597_v33 = vpop.f32.mrb[1].mxu0 }
 0x145   : > { %v353_v34 = vmax.f32 %v350_v32, 0.0 }
 0x147   : > { %631 = vmatmul.mubr.f32.vlgmr.msra.gmra.mrb[0].mxu1 %v353_v34 }
 0x21a   : > { %v443_v36 = vpop.f32.mrb[0].mxu1 }
 0x21b   : > { %v444_v37 = vadd.f32 %v566_v35, %v443_v36  ;;  %v632_v38 = vpop.f32.mrb[1].mxu1 }
 0x21d   : > { %v447_v39 = vmax.f32 %v444_v37, 0.0 }
 0x21f   : > { %448 = vst [vmem:[%s268_s28] sm:$0xff] %v447_v39 }
 0x220   : > { %831 = shalt.err (!%p828_p2)
}
 0x221   : > { %s832_s12 = scalar_lea.hbm %s1124_s15, 128  ;;  %s836_s26 = scalar_lea.hbm %s1173_s5, 256 }
 0x222   : > { %p833_p13 = scmp.ne.s32.totalorder %s1124_s15, %s832_s12  ;;  %p837_p4 = scmp.lt.u32.totalorder %s1124_s15, %s1173_s5 }
 0x223   : > { %p838_p5 = scmp.lt.u32.totalorder %s836_s26, %s832_s12  ;;  %p840_p11 = scmp.lt.u32.totalorder %s832_s12, %s1124_s15 }
 0x224   : > { %p834_p6 = pnand %p833_p13, %p1187_p0 }
 0x225   : > { %p839_p8 = por %p838_p5, %p837_p4 }
 0x226   : > { %p835_p10 = pneg %p834_p6 }
 0x227   : > { %p841_p1 = por %p840_p11, %p839_p8 }
 0x229   : > { %p842_p3 = pnand %p841_p1, %p835_p10 }
 0x22b   : > { %845 = shalt.err (!%p842_p3)
}
 0x22c   : > { %670 = dma.vmem_to_hbm [thread:$0]  (%p1187_p0), %s1126_s7, 128, %s1124_s15, %s450_s16  }
 0x22d PF: > { %s475_s11 = sand.u32 1, %s876_s18   ;;  %p1188_p7 = scmp.ne.s32.totalorder %s1178_s25, 0 }
 0x22e   : > { %p1189_p9 = scmp.ge.s32.totalorder %s888_s21, 2  ;;  %s476_s28 = scalar_lea.sflag [#allocation4], %s475_s11 }
 0x230   : > { %p684_p12 = pnand %p1189_p9, %p1188_p7 }
 0x232   : > { %871 = dma.done.wait (!%p684_p12), %s476_s28, 128  }
 0x233   : > { %873 = vsyncadd (!%p684_p12), %s476_s28, 4294967168  ;;  %p19_p2 = scmp.ge.s32.totalorder %s1039_s14, 4   ;;  %s1190_s18 = smov %s880_s19 }
 0x234   : > { %s1191_s19 = smov %s884_s20  ;;  %s1192_s20 = smov %s1055_s27 }
 0x235   : > { %s1193_s21 = smov %s1039_s14  ;;  %21 = sbr.rel (!%p19_p2) target bundleno = 6 (0x6), region = 93 }
 0x23c   :  { %481 = vsyncpa [#allocation3], 1 }
 0x23d   :  { %483 = vsyncpa [#allocation3 + $0x1], 1 }
 0x23e   :  { %484 = vsyncpa [#allocation6], 1 }
 0x23f   :  { %485 = vsyncpa [#allocation4], 1 }
 0x240   :  { %487 = vsyncpa [#allocation4 + $0x1], 1 }

</bundles_post_ra>
